<compile_context>
chip_gen: v7x
topology: tpu7x:2x2x1
jax: 0.10.0
libtpu: 0.0.40
codegen_flags: <defaults>
</compile_context>

<pallas_src>
import jax
import jax.numpy as jnp
from jax import lax
from jax.experimental import pallas as pl
from jax.experimental.pallas import tpu as pltpu


def _round_up(x, m):
    return ((x + m - 1) // m) * m


# --------------------------------- fused dice kernel ---------------------------------
def _make_dice_kernel(num_classes):
    def kernel(y_ref, lab_ref, out_ref, inter_acc):
        # y_ref:     (B, C, tn) logits tile        lab_ref: (B, 1, tn) int8 labels tile
        # out_ref:   (1, B, 128) per-shard intersect partials (broadcast along lanes)
        # inter_acc: (B, 1, tn) f32 scratch — per-pixel label probability accumulator
        n = pl.program_id(1)

        @pl.when(n == 0)
        def _init():
            inter_acc[...] = jnp.zeros_like(inter_acc)

        y = y_ref[...].astype(jnp.float32)                       # (B, C, tn)
        lab = lab_ref[...].astype(jnp.int32)                     # (B, 1, tn)

        # Numerically-stable softmax pieces; only the label channel's probability is
        # needed, so the full normalized softmax is never materialized.
        m = jnp.max(y, axis=1, keepdims=True)                    # (B, 1, tn)
        e = jnp.exp(y - m)                                       # (B, C, tn)  (EUP)
        denom = jnp.sum(e, axis=1, keepdims=True)                # (B, 1, tn)

        cls = lax.broadcasted_iota(jnp.int32, (1, num_classes, 1), 1)   # (1, C, 1)
        e_lab = jnp.sum(jnp.where(cls == lab, e, 0.0),
                        axis=1, keepdims=True)                   # (B, 1, tn)

        # One divide per pixel; padded columns (label == C) contribute exactly 0.
        # Lane (pixel) reduction is deferred to the finalize.
        inter_acc[...] += e_lab / denom

        @pl.when(n == pl.num_programs(1) - 1)
        def _finalize():
            inter = jnp.sum(inter_acc[...], axis=2)              # (B, 1) lane reduce, once
            out_ref[...] = jnp.broadcast_to(
                inter.reshape(1, inter.shape[0], 1), out_ref.shape
            ).astype(out_ref.dtype)

    return kernel


def dice_loss_pallas(y, y_bar, eps=1e-6):
    B, C, H, W = y.shape
    assert y_bar.shape == (B, 1, H, W), y_bar.shape
    assert C <= 127, "labels are streamed as int8"
    N = H * W

    y2 = y.reshape(B, C, N)                              # stream logits at their own dtype
    lab = y_bar.reshape(B, 1, N).astype(jnp.int8)        # 1 B/pixel label traffic

    # ---------------- tile-size / padding selection (sublane-padding aware) ----------
    n_shards = 2                                         # v7x: one per TensorCore; no-op on 1-TC parts
    y_itemsize = jnp.dtype(y.dtype).itemsize
    c_pad = _round_up(C, 32 // y_itemsize)               # logits sublane pad: f32->8, bf16->16
    lab_pad_bytes = 32                                   # (.,1,.) int8 label pads to 32 sublanes
    bytes_per_col = B * (c_pad * y_itemsize + lab_pad_bytes)

    budget = 20 * 1024 * 1024                            # double-buffered input tiles (v7x 64 MiB safe)
    tn = max(128, (budget // (2 * bytes_per_col)) // 128 * 128)
    per_shard = _round_up(-(-_round_up(N, 128) // n_shards), 128)
    tn = min(tn, per_shard)                              # never bigger than a shard's work
    tiles_per_shard = -(-per_shard // tn)
    tn = _round_up(-(-per_shard // tiles_per_shard), 128)  # rebalance to minimize padding
    Np = n_shards * tiles_per_shard * tn

    if Np != N:
        y2 = jnp.pad(y2, ((0, 0), (0, 0), (0, Np - N)))
        lab = jnp.pad(lab, ((0, 0), (0, 0), (0, Np - N)), constant_values=C)

    # VMEM budget derived from the actual (sublane-padded) tile footprints.
    vmem_needed = (2 * B * c_pad * tn * y_itemsize        # double-buffered logits tiles
                   + 2 * B * lab_pad_bytes * tn           # double-buffered label tiles
                   + B * 8 * tn * 4                       # (B,1,tn) f32 accumulator (padded)
                   + B * 8 * 128 * 4)                     # output tile
    vmem_limit = int(min(max(2 * vmem_needed, 4 * 1024 * 1024), 30 * 1024 * 1024))

    partials = pl.pallas_call(
        _make_dice_kernel(C),
        out_shape=jax.ShapeDtypeStruct((n_shards, B, 128), jnp.float32),
        grid_spec=pltpu.PrefetchScalarGridSpec(
            num_scalar_prefetch=0,
            grid=(n_shards, tiles_per_shard),
            in_specs=[
                pl.BlockSpec((B, C, tn), lambda s, n: (0, 0, s * tiles_per_shard + n)),
                pl.BlockSpec((B, 1, tn), lambda s, n: (0, 0, s * tiles_per_shard + n)),
            ],
            out_specs=pl.BlockSpec((1, B, 128), lambda s, n: (s, 0, 0)),
            scratch_shapes=[pltpu.VMEM((B, 1, tn), jnp.float32)],
        ),
        compiler_params=pltpu.CompilerParams(
            dimension_semantics=("parallel", "arbitrary"),   # shards parallel, pixel tiles carry acc
            vmem_limit_bytes=vmem_limit),
    )(y2, lab)

    # Trivial epilogue in the wrapper (keeps the in-kernel finalize shard-local).
    intersect = jnp.sum(partials[:, :, 0], axis=0)        # (B,)
    cards = jnp.float32(2 * N)                            # analytic: softmax & one-hot each sum to 1/pixel
    score = 2.0 * intersect / (cards + eps)
    return jnp.mean(1.0 - score)


# --------------------------------- pure-JAX reference ---------------------------------
def dice_loss_reference(y, y_bar, eps=1e-6):
    y_soft = jax.nn.softmax(y, axis=1)
    one_hots = jax.nn.one_hot(y_bar[:, 0], y.shape[1], axis=1, dtype=y_soft.dtype)
    intersect = jnp.sum(y_soft * one_hots, axis=(1, 2, 3))
    cards = jnp.sum(y_soft + one_hots, axis=(1, 2, 3))
    score = 2.0 * intersect / (cards + eps)
    return jnp.mean(1.0 - score)


if __name__ == "__main__":
    key = jax.random.PRNGKey(0)
    k_logits, k_labels = jax.random.split(key)

    # Small shapes consistent with the module: (B, C, H, W) logits, (B, 1, H, W) labels.
    B, C, H, W = 2, 4, 16, 16
    y = jax.random.normal(k_logits, (B, C, H, W), jnp.float32)
    y_bar = jax.random.randint(k_labels, (B, 1, H, W), 0, C, dtype=jnp.int32)

    loss = jax.block_until_ready(jax.jit(dice_loss_pallas)(y, y_bar))
    ref = jax.block_until_ready(jax.jit(dice_loss_reference)(y, y_bar))

    assert loss.shape == (), loss.shape
    assert bool(jnp.isfinite(loss)), float(loss)
    err = float(jnp.abs(loss - ref))
    assert err < 1e-5, (float(loss), float(ref), err)
    print("KERNEL_OK")
</pallas_src>

<mosaic_0001>
module attributes {stable_mosaic.version = 11 : i64} {
  func.func @kernel(%arg0: i32, %arg1: i32, %arg2: memref<2x4x128xf32, #tpu.memory_space<vmem>>, %arg3: memref<2x1x128xi8, #tpu.memory_space<vmem>>, %arg4: memref<1x2x128xf32, #tpu.memory_space<vmem>>, %arg5: memref<2x1x128xf32, #tpu.memory_space<vmem>>) attributes {dimension_semantics = [#tpu.dimension_semantics<parallel>, #tpu.dimension_semantics<arbitrary>], iteration_bounds = array<i64: 2, 1>, scalar_prefetch = 0 : i64, scratch_operands = 1 : i64, tpu.core_type = #tpu.core_type<tc>, window_params = [{transform_indices = @transform_0, window_bounds = array<i64: 2, 4, 128>}, {transform_indices = @transform_1, window_bounds = array<i64: 2, 1, 128>}, {transform_indices = @transform_2, window_bounds = array<i64: 1, 2, 128>}]} {
    %c0_i32 = arith.constant 0 : i32
    %0 = arith.cmpi eq, %arg1, %c0_i32 : i32
    %1 = arith.extui %0 : i1 to i32
    %c0_i32_0 = arith.constant 0 : i32
    %2 = arith.cmpi ne, %1, %c0_i32_0 : i32
    scf.if %2 {
      %cst_17 = arith.constant 0.000000e+00 : f32
      %28 = vector.broadcast %cst_17 : f32 to vector<2x1x128xf32>
      %c0_18 = arith.constant 0 : index
      %c0_19 = arith.constant 0 : index
      %c0_20 = arith.constant 0 : index
      %29 = vector.load %arg5[%c0_18, %c0_19, %c0_20] : memref<2x1x128xf32, #tpu.memory_space<vmem>>, vector<2x1x128xf32>
      tpu.vector_store %arg5[%c0_18, %c0_19, %c0_20], %28 {strides = array<i32>} : memref<2x1x128xf32, #tpu.memory_space<vmem>>, vector<2x1x128xf32>,
    } else {
    }
    %c0 = arith.constant 0 : index
    %c0_1 = arith.constant 0 : index
    %c0_2 = arith.constant 0 : index
    %3 = vector.load %arg2[%c0, %c0_1, %c0_2] : memref<2x4x128xf32, #tpu.memory_space<vmem>>, vector<2x4x128xf32>
    %c0_3 = arith.constant 0 : index
    %c0_4 = arith.constant 0 : index
    %c0_5 = arith.constant 0 : index
    %4 = vector.load %arg3[%c0_3, %c0_4, %c0_5] : memref<2x1x128xi8, #tpu.memory_space<vmem>>, vector<2x1x128xi8>
    %5 = arith.extsi %4 : vector<2x1x128xi8> to vector<2x1x128xi32>
    %cst = arith.constant dense<0xFF800000> : vector<2x128xf32>
    %6 = vector.multi_reduction <maximumf>, %3, %cst [1] : vector<2x4x128xf32> to vector<2x128xf32>
    %7 = vector.shape_cast %6 : vector<2x128xf32> to vector<2x1x128xf32>
    %8 = vector.broadcast %7 : vector<2x1x128xf32> to vector<2x4x128xf32>
    %9 = arith.subf %3, %8 : vector<2x4x128xf32>
    %10 = math.exp %9 : vector<2x4x128xf32>
    %cst_6 = arith.constant dense<0.000000e+00> : vector<2x128xf32>
    %11 = vector.multi_reduction <add>, %10, %cst_6 [1] : vector<2x4x128xf32> to vector<2x128xf32>
    %12 = vector.shape_cast %11 : vector<2x128xf32> to vector<2x1x128xf32>
    %13 = tpu.iota {dimensions = array<i32: 1>} : vector<1x4x1xi32>
    %14 = vector.broadcast %13 : vector<1x4x1xi32> to vector<2x4x128xi32>
    %15 = vector.broadcast %5 : vector<2x1x128xi32> to vector<2x4x128xi32>
    %16 = arith.cmpi eq, %14, %15 : vector<2x4x128xi32>
    %cst_7 = arith.constant 0.000000e+00 : f32
    %17 = vector.broadcast %cst_7 : f32 to vector<2x4x128xf32>
    %18 = arith.select %16, %10, %17 : vector<2x4x128xi1>, vector<2x4x128xf32>
    %cst_8 = arith.constant dense<0.000000e+00> : vector<2x128xf32>
    %19 = vector.multi_reduction <add>, %18, %cst_8 [1] : vector<2x4x128xf32> to vector<2x128xf32>
    %20 = vector.shape_cast %19 : vector<2x128xf32> to vector<2x1x128xf32>
    %c0_9 = arith.constant 0 : index
    %c0_10 = arith.constant 0 : index
    %c0_11 = arith.constant 0 : index
    %21 = vector.load %arg5[%c0_9, %c0_10, %c0_11] : memref<2x1x128xf32, #tpu.memory_space<vmem>>, vector<2x1x128xf32>
    %22 = arith.divf %20, %12 : vector<2x1x128xf32>
    %23 = arith.addf %21, %22 : vector<2x1x128xf32>
    %c0_12 = arith.constant 0 : index
    %c0_13 = arith.constant 0 : index
    %c0_14 = arith.constant 0 : index
    %24 = vector.load %arg5[%c0_12, %c0_13, %c0_14] : memref<2x1x128xf32, #tpu.memory_space<vmem>>, vector<2x1x128xf32>
    tpu.vector_store %arg5[%c0_12, %c0_13, %c0_14], %23 {strides = array<i32>} : memref<2x1x128xf32, #tpu.memory_space<vmem>>, vector<2x1x128xf32>,
    %c0_i32_15 = arith.constant 0 : i32
    %25 = arith.cmpi eq, %arg1, %c0_i32_15 : i32
    %26 = arith.extui %25 : i1 to i32
    %c0_i32_16 = arith.constant 0 : i32
    %27 = arith.cmpi ne, %26, %c0_i32_16 : i32
    scf.if %27 {
      %c0_17 = arith.constant 0 : index
      %c0_18 = arith.constant 0 : index
      %c0_19 = arith.constant 0 : index
      %28 = vector.load %arg5[%c0_17, %c0_18, %c0_19] : memref<2x1x128xf32, #tpu.memory_space<vmem>>, vector<2x1x128xf32>
      %cst_20 = arith.constant dense<0.000000e+00> : vector<2x1xf32>
      %29 = vector.multi_reduction <add>, %28, %cst_20 [2] : vector<2x1x128xf32> to vector<2x1xf32>
      %30 = vector.shape_cast %29 : vector<2x1xf32> to vector<1x2x1xf32>
      %31 = vector.shape_cast %30 : vector<1x2x1xf32> to vector<1x2x1xf32>
      %32 = vector.broadcast %31 : vector<1x2x1xf32> to vector<1x2x128xf32>
      %c0_21 = arith.constant 0 : index
      %c0_22 = arith.constant 0 : index
      %c0_23 = arith.constant 0 : index
      %33 = vector.load %arg4[%c0_21, %c0_22, %c0_23] : memref<1x2x128xf32, #tpu.memory_space<vmem>>, vector<1x2x128xf32>
      tpu.vector_store %arg4[%c0_21, %c0_22, %c0_23], %32 {strides = array<i32>} : memref<1x2x128xf32, #tpu.memory_space<vmem>>, vector<1x2x128xf32>,
    } else {
    }
    return
  }
  func.func @transform_0(%arg0: i32, %arg1: i32) -> (i32, i32, i32) {
    %c1_i32 = arith.constant 1 : i32
    %0 = arith.muli %arg0, %c1_i32 : i32
    %1 = arith.addi %0, %arg1 : i32
    %c0_i32 = arith.constant 0 : i32
    %c0_i32_0 = arith.constant 0 : i32
    %c0_i32_1 = arith.constant 0 : i32
    return %c0_i32, %c0_i32_0, %1 : i32, i32, i32
  }
  func.func @transform_1(%arg0: i32, %arg1: i32) -> (i32, i32, i32) {
    %c1_i32 = arith.constant 1 : i32
    %0 = arith.muli %arg0, %c1_i32 : i32
    %1 = arith.addi %0, %arg1 : i32
    %c0_i32 = arith.constant 0 : i32
    %c0_i32_0 = arith.constant 0 : i32
    %c0_i32_1 = arith.constant 0 : i32
    return %c0_i32, %c0_i32_0, %1 : i32, i32, i32
  }
  func.func @transform_2(%arg0: i32, %arg1: i32) -> (i32, i32, i32) {
    %c0_i32 = arith.constant 0 : i32
    %c0_i32_0 = arith.constant 0 : i32
    %c0_i32_1 = arith.constant 0 : i32
    return %arg0, %c0_i32, %c0_i32_0 : i32, i32, i32
  }
}

</mosaic_0001>

<bundles_post_ra>
// kernel: dice_loss_pallas.1
= control target key start
LH: loop header
LB: loop body
LE: loop exit
PB: predicated region body
PF: predicated region fallthrough
CT: control target
= control target key end

     0   :  { %s571_s9 = smov 0   ;;  %s573_s10 = smov 0   ;;  %s656_s0 = inlined_call_operand.vmem [shape: f32[2,4,256], index: 0, kind: input, shape index: {}]   ;;  %s657_s1 = inlined_call_operand.vmem [shape: s8[2,1,256], index: 1, kind: input, shape index: {}]   ;;  %s658_s2 = inlined_call_operand.vmem [shape: f32[2,2,128], index: 2, kind: output, shape index: {}]  }
   0x1   :  { %s575_s11 = smov 0   ;;  %s577_s12 = smov 0  }
   0x2   :  { %s579_s13 = smov 0  }
   0x3 LB: > { %s24_s14 = sadd.s32 1, %s549_s12  ;;  %p40_p1 = scmp.ne.s32.totalorder %s541_s10, %s537_s9  ;;  %s553_s13 = sphi %s579_s13, %s12_s13   ;;  %s549_s12 = sphi %s577_s12, %s663_s12   ;;  %s545_s11 = sphi %s575_s11, %s662_s11   ;;  %s541_s10 = sphi %s573_s10, %s661_s10   ;;  %s537_s9 = sphi %s571_s9, %s660_s9  }
   0x4   : > { %p26_p0 = scmp.ge.s32.totalorder %s24_s14, 2  ;;  %p41_p2 = scmp.eq.s32.totalorder %s553_s13, 0 }
   0x5   : > { %s33_s17 = sadd.s32 1, %s541_s10  ;;  %p456_p5 = scmp.ge.s32.totalorder %s553_s13, 2 }
   0x6   : > { %s665_s14 = smov (%p26_p0, %s24_s14), 0  ;;  %p602_p3 = por %p41_p2, %p40_p1 }
   0x7   : > { %s30_s16 = ssub.s32 %s549_s12, %s665_s14  ;;  %120 = sbr.rel (%p456_p5) target bundleno = 28 (0x1c), region = 16 }
   0x8   : > { %p31_p4 = scmp.eq.s32.totalorder %s30_s16, 0 }
   0xa   : > { %s610_s18 = scalar_select %p31_p4, %s541_s10, %s33_s17  }
   0xe   : > { %123 = sbr.rel (!%p602_p3) target bundleno = 21 (0x15), region = 20  ;;  %s125_s19 = sand.u32 (%p602_p3), 1, %s541_s10  }
   0xf   : > { %s458_s20 = sshll.u32 (%p602_p3), %s549_s12, 2  ;;  %s457_s21 = sshll.u32 (%p602_p3), %s125_s19, 3 }
  0x10   : > { %s130_s24 = scalar_lea.vmem (%p602_p3), %s656_s0, %s458_s20  ;;  %s127_s25 = scalar_lea.vmem (%p602_p3), [#allocation3], %s457_s21 }
  0x11   : > { %v146_v0 = vld [vmem:[%s130_s24] sm:$0xf] (%p602_p3)  ;;  %v148_v1 = vld [vmem:[%s130_s24 + $0x8] sm:$0xf] (%p602_p3) }
  0x12   : > { %147 = vst [vmem:[%s127_s25] sm:$0xf] (%p602_p3), %v146_v0  ;;  %149 = vst [vmem:[%s127_s25 + $0x4] sm:$0xf] (%p602_p3), %v148_v1 }
  0x15 PF: > { %176 = sbr.rel (!%p602_p3) target bundleno = 28 (0x1c), region = 61  ;;  %s178_s26 = sand.u32 (%p602_p3), 1, %s541_s10  }
  0x16   : > { %s182_s29 = scalar_lea.vmem (%p602_p3), %s657_s1, %s549_s12  ;;  %s459_s30 = sshll.u32 (%p602_p3), %s178_s26, 1 }
  0x17   : > { %v198_v2 = vld [vmem:[%s182_s29] sm:$0x1] (%p602_p3)  ;;  %v200_v3 = vld [vmem:[%s182_s29 + $0x2] sm:$0x1] (%p602_p3)  ;;  %s180_s3 = scalar_lea.vmem (%p602_p3), [#allocation4], %s459_s30 }
  0x18   : > { %199 = vst [vmem:[%s180_s3] sm:$0x1] (%p602_p3), %v198_v2  ;;  %201 = vst [vmem:[%s180_s3 + $0x1] sm:$0x1] (%p602_p3), %v200_v3 }
  0x1c PF: > { %p460_p6 = scmp.ge.s32.totalorder %s553_s13, 1  ;;  %p219_p7 = scmp.lt.s32.totalorder %s553_s13, 3 }
  0x1e   : > { %p220_p8 = pnand %p460_p6, %p219_p7 }
  0x1f   : > { %s226_s4 = sand.u32 (!%p220_p8), 1, %s537_s9   ;;  %v555_v4 = vmov (!%p220_p8), 0.0   ;;  %vm275_vm0 = vcmask (!%p220_p8), 1043456   ;;  %v310_v18 = vlaneseq (!%p220_p8)  ;;  %vm353_vm3 = vcmask (!%p220_p8), 1040384   ;;  %p259_p9 = scmp.lt.s32.totalorder (!%p220_p8), %s545_s11, 1 }
  0x20   : > { %223 = sbr.rel (%p220_p8) target bundleno = 248 (0xf8), region = 95  ;;  %s461_s5 = sshll.u32 (!%p220_p8), %s226_s4, 3  ;;  %268 = vst [vmem:[#allocation2 + $0x1] sm:$0x1] (!%p220_p8), %v555_v4  ;;  %267 = vst [vmem:[#allocation2] sm:$0x1] (!%p220_p8), %v555_v4 }
  0x21   : > { %s228_s6 = scalar_lea.vmem (!%p220_p8), [#allocation3], %s461_s5  ;;  %s462_s7 = sshll.u32 (!%p220_p8), %s226_s4, 1  ;;  %v311_v23 = vshrl.u32 (!%p220_p8), %v310_v18, 7  ;;  %vm363_vm4 = vcmask (!%p220_p8), 1041409  }
  0x22   : > { %v270_v5 = vld [vmem:[%s228_s6 + $0x4] sm:$0xf] (!%p220_p8)  ;;  %v269_v6 = vld [vmem:[%s228_s6] sm:$0xf] (!%p220_p8)  ;;  %s235_s8 = scalar_lea.vmem (!%p220_p8), [#allocation4], %s462_s7 }
  0x23   : > { %v283_v7 = vsel (!%p220_p8), %vm275_vm0, %v270_v5, -inf  ;;  %v276_v8 = vsel (!%p220_p8), %vm275_vm0, %v269_v6, -inf  ;;  %v272_v25 = vld [vmem:[%s235_s8 + $0x1] sm:$0x1] (!%p220_p8)  ;;  %v271_v28 = vld [vmem:[%s235_s8] sm:$0x1] (!%p220_p8) }
  0x24   : > { %v284_v9 = vrot.slane (!%p220_p8), %v283_v7, 4  ;;  %v277_v10 = vrot.slane (!%p220_p8), %v276_v8, 4  ;;  %v274_v29 = vunpack.c.0.s8 (!%p220_p8), %v272_v25  ;;  %v314_v30 = vsub.s32 (!%p220_p8), 0, %v311_v23 }
  0x25   : > { %v273_v31 = vunpack.c.0.s8 (!%p220_p8), %v271_v28 }
  0x26   : > { %v285_v11 = vmax.f32 (!%p220_p8), %v283_v7, %v284_v9  ;;  %v278_v12 = vmax.f32 (!%p220_p8), %v276_v8, %v277_v10  ;;  %v319_v32 = vrot.slane (!%p220_p8), %v274_v29, %v314_v30 }
  0x27   : > { %v315_v33 = vrot.slane %v273_v31, %v314_v30  ;;  %v339_v3 = vld [vmem:[#allocation2 + $0x1] sm:$0x1]  ;;  %s667_s11 = smov (!%p259_p9, %s545_s11), 1 }
  0x28   : > { %v286_v13 = vrot.slane %v285_v11, 2  ;;  %v279_v14 = vrot.slane %v278_v12, 2  ;;  %vm321_vm1 = vcmp.eq.s32.totalorder %v311_v23, %v319_v32  ;;  %s463_s9 = sshll.u32 %s667_s11, 1 }
  0x29   : > { %vm320_vm2 = vcmp.eq.s32.totalorder %v311_v23, %v315_v33  ;;  %s262_s17 = scalar_lea.vmem %s658_s2, %s463_s9 }
  0x2a   : > { %v287_v15 = vmax.f32 %v285_v11, %v286_v13  ;;  %v280_v16 = vmax.f32 %v278_v12, %v279_v14 }
  0x2c   : > { %v288_v17 = vrot.slane %v287_v15, 1  ;;  %v281_v19 = vrot.slane %v280_v16, 1 }
  0x2e   : > { %v289_v20 = vmax.f32 %v287_v15, %v288_v17  ;;  %v282_v21 = vmax.f32 %v280_v16, %v281_v19 }
  0x30   : > { %v291_v22 = vsub.f32 %v270_v5, %v289_v20  ;;  %v290_v24 = vsub.f32 %v269_v6, %v282_v21  ;;  %v338_v6 = vld [vmem:[#allocation2] sm:$0x1] }
  0x32   : > { %v294_v26 = vmul.f32 1.442695, %v291_v22  ;;  %v292_v27 = vmul.f32 1.442695, %v290_v24 }
  0x34   : > { %507 = vpow2.f32 %v294_v26 }
  0x35   : > { %509 = vpow2.f32 %v292_v27 }
  0x3e   : > { %v508_v34 = vpop.eup %507 }
  0x3f   : > { %v510_v35 = vpop.eup %509  ;;  %v303_v36 = vsel %vm275_vm0, %v508_v34, 0.0  ;;  %v323_v37 = vsel %vm321_vm1, %v508_v34, 0.0 }
  0x40   : > { %v304_v38 = vrot.slane %v303_v36, 4  ;;  %v331_v39 = vsel %vm275_vm0, %v323_v37, 0.0  ;;  %v296_v40 = vsel %vm275_vm0, %v510_v35, 0.0  ;;  %v322_v41 = vsel %vm320_vm2, %v510_v35, 0.0 }
  0x41   : > { %v332_v42 = vrot.slane %v331_v39, 4  ;;  %v297_v43 = vrot.slane %v296_v40, 4  ;;  %v324_v44 = vsel %vm275_vm0, %v322_v41, 0.0 }
  0x42   : > { %v305_v45 = vadd.f32 %v304_v38, %v303_v36  ;;  %v325_v46 = vrot.slane %v324_v44, 4 }
  0x43   : > { %v333_v47 = vadd.f32 %v332_v42, %v331_v39  ;;  %v298_v48 = vadd.f32 %v297_v43, %v296_v40 }
  0x44   : > { %v306_v49 = vrot.slane %v305_v45, 2  ;;  %v326_v50 = vadd.f32 %v325_v46, %v324_v44 }
  0x45   : > { %v299_v51 = vrot.slane %v298_v48, 2  ;;  %v334_v53 = vrot.slane %v333_v47, 2 }
  0x46   : > { %v307_v52 = vadd.f32 %v306_v49, %v305_v45  ;;  %v327_v56 = vrot.slane %v326_v50, 2 }
  0x47   : > { %v300_v54 = vadd.f32 %v299_v51, %v298_v48  ;;  %v335_v59 = vadd.f32 %v334_v53, %v333_v47 }
  0x48   : > { %v308_v55 = vrot.slane %v307_v52, 1  ;;  %v328_v61 = vadd.f32 %v327_v56, %v326_v50 }
  0x49   : > { %v301_v57 = vrot.slane %v300_v54, 1  ;;  %v336_v62 = vrot.slane %v335_v59, 1 }
  0x4a   : > { %v309_v58 = vadd.f32 %v308_v55, %v307_v52  ;;  %v329_v63 = vrot.slane %v328_v61, 1 }
  0x4b   : > { %v302_v60 = vadd.f32 %v301_v57, %v300_v54  ;;  %v337_v0 = vadd.f32 %v336_v62, %v335_v59 }
  0x4c   : > { %511 = vrcp.f32 %v309_v58  ;;  %v330_v1 = vadd.f32 %v329_v63, %v328_v61 }
  0x4d   : > { %513 = vrcp.f32 %v302_v60 }
  0x56   : > { %v512_v2 = vpop.eup %511 }
  0x57   : > { %v514_v4 = vpop.eup %513  ;;  %v343_v5 = vmul.f32 %v512_v2, %v337_v0 }
  0x58   : > { %v341_v7 = vmul.f32 %v514_v4, %v330_v1 }
  0x59   : > { %v345_v8 = vadd.f32 %v343_v5, %v339_v3 }
  0x5a   : > { %v344_v9 = vadd.f32 %v341_v7, %v338_v6 }
  0x5b   : > { %347 = vst [vmem:[#allocation2 + $0x1] sm:$0x1] %v345_v8 }
  0x5c   : > { %346 = vst [vmem:[#allocation2] sm:$0x1] %v344_v9 }
  0x62   : > { %v352_v10 = vld [vmem:[#allocation2 + $0x1] sm:$0x1] }
  0x63   : > { %v357_v11 = vsel %vm353_vm3, %v352_v10, 0.0  ;;  %v351_v12 = vld [vmem:[#allocation2] sm:$0x1] }
  0x64   : > { %358 = vadd.xlane.f32.xlu0 %v357_v11  ;;  %v354_v13 = vsel %vm353_vm3, %v351_v12, 0.0 }
  0x68   : > { %355 = vadd.xlane.f32.xlu0 %v354_v13 }
  0xf1   : > { %v359_v14 = vpop.xlane.xlu0 %358 }
  0xf2   : > { %v362_v15 = vrot.slane %v359_v14, 7 }
  0xf5   : > { %v356_v16 = vpop.xlane.xlu0 %355 }
  0xf6   : > { %v364_v17 = vsel %vm363_vm4, %v362_v15, %v356_v16 }
  0xf7   : > { %366 = vst [vmem:[%s262_s17] sm:$0x3] %v364_v17 }
  0xf8 PF: > { %s12_s13 = sadd.s32 1, %s553_s13   ;;  %s660_s9 = smov %s541_s10 }
  0xf9   : > { %p9_p10 = scmp.ge.s32.totalorder %s12_s13, 4   ;;  %s661_s10 = smov %s610_s18 }
  0xfa   : > { %s662_s11 = smov %s549_s12  ;;  %s663_s12 = smov %s665_s14 }
  0xfb   :  { %11 = sbr.rel (!%p9_p10) target bundleno = 3 (0x3), region = 154 }

</bundles_post_ra>
